<compile_context>
chip_gen: v5e
topology: v5e:2x2
jax: 0.10.0
libtpu: 0.0.40
codegen_flags: <defaults>
</compile_context>

<pallas_src>
import jax
import jax.numpy as jnp
from jax.experimental import pallas as pl
from jax.experimental.pallas import tpu as pltpu


# ----------------------------- kernels -----------------------------

def _q_critic_merged_kernel(sa_ref, w1_ref, b1_ref, w2_ref, b2_ref, w3_ref, b3_ref,
                            q_ref):
    """Both Q heads fused into one (TB, 2*net_width) chain; q_ref is (TB, 2)."""
    sa = sa_ref[...]
    h = jnp.dot(sa, w1_ref[...], preferred_element_type=jnp.float32) + b1_ref[...]
    h = jnp.maximum(h, 0.0)
    h = jnp.dot(h, w2_ref[...], preferred_element_type=jnp.float32) + b2_ref[...]
    h = jnp.maximum(h, 0.0)
    q_ref[...] = jnp.dot(h, w3_ref[...], preferred_element_type=jnp.float32) + b3_ref[...]


def _q_critic_split_kernel(sa_ref,
                           w11_ref, b11_ref, w21_ref, b21_ref, w31_ref, b31_ref,
                           w12_ref, b12_ref, w22_ref, b22_ref, w32_ref, b32_ref,
                           q_ref):
    """Wide-net fallback (2*net_width > 128): heads kept separate so layer 2 stays
    dense per head (a block-diagonal merge would double its FLOPs), but both heads
    share one sa operand and one (TB, 2) output block."""
    sa = sa_ref[...]

    h1 = jnp.dot(sa, w11_ref[...], preferred_element_type=jnp.float32) + b11_ref[...]
    h1 = jnp.maximum(h1, 0.0)
    h1 = jnp.dot(h1, w21_ref[...], preferred_element_type=jnp.float32) + b21_ref[...]
    h1 = jnp.maximum(h1, 0.0)
    q1 = jnp.dot(h1, w31_ref[...], preferred_element_type=jnp.float32) + b31_ref[...]

    h2 = jnp.dot(sa, w12_ref[...], preferred_element_type=jnp.float32) + b12_ref[...]
    h2 = jnp.maximum(h2, 0.0)
    h2 = jnp.dot(h2, w22_ref[...], preferred_element_type=jnp.float32) + b22_ref[...]
    h2 = jnp.maximum(h2, 0.0)
    q2 = jnp.dot(h2, w32_ref[...], preferred_element_type=jnp.float32) + b32_ref[...]

    q_ref[...] = jnp.concatenate([q1, q2], axis=1)


# ----------------------------- wrapper helpers -----------------------------

def _fuse_head(wt, bt, wl, bl, w1, b1, *, user_num, state_dim):
    """Fold fc_t / fc_loc layers + concat into l1 (exact, no activation in between):
       sa @ W1.T + b1  ->  state @ Ws_eff + action @ Wa + b_eff."""
    U = user_num
    w1T = w1.T                                 # (2U + state_dim-3 + action_dim, net_width)
    w1t = w1T[:U, :]                           # multiplies t
    w1l = w1T[U:2 * U, :]                      # multiplies loc
    w1s = w1T[2 * U:2 * U + state_dim - 3, :]  # multiplies state[:, :-3]
    w1a = w1T[2 * U + state_dim - 3:, :]       # multiplies action
    # state column order is [s_rest, loc, t]  (loc = state[:, -3:-1], t = state[:, -1:])
    ws_eff = jnp.concatenate([w1s, wl.T @ w1l, wt.T @ w1t], axis=0)   # (state_dim, W)
    b_eff = (b1 + bt @ w1t + bl @ w1l).reshape(1, -1)                 # (1, W)
    return ws_eff, w1a, b_eff


def _block_diag(a, b):
    za = jnp.zeros((a.shape[0], b.shape[1]), a.dtype)
    zb = jnp.zeros((b.shape[0], a.shape[1]), a.dtype)
    top = jnp.concatenate([a, za], axis=1)
    bot = jnp.concatenate([zb, b], axis=1)
    return jnp.concatenate([top, bot], axis=0)


def _round_up(x, m):
    return (x + m - 1) // m * m


# ----------------------------- forward -----------------------------

def q_critic_forward(state, action, params, *, user_num):
    """Pallas wrapper. `params` holds torch-layout (out,in) weights and (out,) biases."""
    B, state_dim = state.shape
    action_dim = action.shape[1]
    net_width = params["w2"].shape[0]

    # ---- algebraic fusion of fc_t / fc_loc + concat into l1 / l4 (exact) ----
    ws1, wa1, b1e = _fuse_head(params["wt"], params["bt"], params["wl"], params["bl"],
                               params["w1"], params["b1"],
                               user_num=user_num, state_dim=state_dim)
    ws2, wa2, b4e = _fuse_head(params["wt2"], params["bt2"], params["wl2"], params["bl2"],
                               params["w4"], params["b4"],
                               user_num=user_num, state_dim=state_dim)

    # ---- fold action into the state operand: one layer-1 matmul per head ----
    K = state_dim + action_dim
    Kp = _round_up(K, 8)
    wsa1 = jnp.concatenate([ws1, wa1], axis=0)             # (K, net_width)
    wsa2 = jnp.concatenate([ws2, wa2], axis=0)
    if Kp != K:                                            # zero rows are exact
        wsa1 = jnp.pad(wsa1, ((0, Kp - K), (0, 0)))
        wsa2 = jnp.pad(wsa2, ((0, Kp - K), (0, 0)))

    w2 = params["w2"].T
    b2 = params["b2"].reshape(1, -1)
    w3 = params["w3"].T                                    # (net_width, 1)
    b3 = params["b3"].reshape(1, -1)
    w5 = params["w5"].T
    b5 = params["b5"].reshape(1, -1)
    w6 = params["w6"].T
    b6 = params["b6"].reshape(1, -1)

    merged = (2 * net_width) <= 128
    if merged:
        # merge both Q heads into one wide 3-matmul chain
        w1m = jnp.concatenate([wsa1, wsa2], axis=1)        # (Kp, 2W)
        b1m = jnp.concatenate([b1e, b4e], axis=1)          # (1, 2W)
        w2m = _block_diag(w2, w5)                          # (2W, 2W)
        b2m = jnp.concatenate([b2, b5], axis=1)            # (1, 2W)
        w3m = _block_diag(w3, w6)                          # (2W, 2)
        b3m = jnp.concatenate([b3, b6], axis=1)            # (1, 2)
        weights = (w1m, b1m, w2m, b2m, w3m, b3m)
        kernel = _q_critic_merged_kernel
    else:
        weights = (wsa1, b1e, w2, b2, w3, b3,
                   wsa2, b4e, w5, b5, w6, b6)
        kernel = _q_critic_split_kernel

    # ---- batch tiling: size the tile from B, >= 2 steps for large B (v7x megacore) ----
    B8 = _round_up(max(B, 1), 8)
    if B8 <= 1024:
        n_steps = 1                          # tiny batch: single step
    else:
        n_steps = max(2, pl.cdiv(B8, 8192))  # >= 2 steps, tiles capped at ~8192 rows
    TB = _round_up(pl.cdiv(B8, n_steps), 8)
    Bp = TB * n_steps

    sa = jnp.concatenate([state, action], axis=1)          # (B, K)
    sa = jnp.pad(sa, ((0, Bp - B), (0, Kp - K)))           # zero rows/cols are exact

    sa_spec = pl.BlockSpec((TB, Kp), lambda i: (i, 0))

    def wspec(w):
        return pl.BlockSpec(w.shape, lambda i: (0, 0))     # VMEM-resident across grid

    out_spec = pl.BlockSpec((TB, 2), lambda i: (i, 0))

    q = pl.pallas_call(
        kernel,
        grid=(n_steps,),
        in_specs=[sa_spec] + [wspec(w) for w in weights],
        out_specs=out_spec,
        out_shape=jax.ShapeDtypeStruct((Bp, 2), jnp.float32),
        compiler_params=pltpu.CompilerParams(dimension_semantics=("parallel",)),
    )(sa, *weights)

    return q[:B, 0:1], q[:B, 1:2]


# ----------------------------- init + reference -----------------------------

def init_params(key, state_dim, action_dim, net_width, user_num):
    """Deterministic PyTorch-style U(-1/sqrt(fan_in), 1/sqrt(fan_in)) init."""
    def linear(k, out_f, in_f):
        bound = 1.0 / jnp.sqrt(jnp.float32(in_f))
        kw, kb = jax.random.split(k)
        w = jax.random.uniform(kw, (out_f, in_f), jnp.float32, -bound, bound)
        b = jax.random.uniform(kb, (out_f,), jnp.float32, -bound, bound)
        return w, b

    keys = jax.random.split(key, 10)
    sa_dim = state_dim - 3 + user_num * 2 + action_dim
    wt, bt = linear(keys[0], user_num, 1)
    wl, bl = linear(keys[1], user_num, 2)
    w1, b1 = linear(keys[2], net_width, sa_dim)
    w2, b2 = linear(keys[3], net_width, net_width)
    w3, b3 = linear(keys[4], 1, net_width)
    wt2, bt2 = linear(keys[5], user_num, 1)
    wl2, bl2 = linear(keys[6], user_num, 2)
    w4, b4 = linear(keys[7], net_width, sa_dim)
    w5, b5 = linear(keys[8], net_width, net_width)
    w6, b6 = linear(keys[9], 1, net_width)
    return dict(wt=wt, bt=bt, wl=wl, bl=bl, w1=w1, b1=b1, w2=w2, b2=b2, w3=w3, b3=b3,
                wt2=wt2, bt2=bt2, wl2=wl2, bl2=bl2, w4=w4, b4=b4, w5=w5, b5=b5,
                w6=w6, b6=b6)


def q_critic_reference(state, action, params):
    """Plain-JAX mirror of the PyTorch forward (for verification)."""
    def head(wt, bt, wl, bl, wa, ba, wb, bb, wc, bc):
        t = state[:, -1:] @ wt.T + bt
        loc = state[:, -3:-1] @ wl.T + bl
        sa = jnp.concatenate([t, loc, state[:, :-3], action], axis=1)
        q = jax.nn.relu(sa @ wa.T + ba)
        q = jax.nn.relu(q @ wb.T + bb)
        return q @ wc.T + bc

    q1 = head(params["wt"], params["bt"], params["wl"], params["bl"],
              params["w1"], params["b1"], params["w2"], params["b2"],
              params["w3"], params["b3"])
    q2 = head(params["wt2"], params["bt2"], params["wl2"], params["bl2"],
              params["w4"], params["b4"], params["w5"], params["b5"],
              params["w6"], params["b6"])
    return q1, q2


if __name__ == "__main__":
    batch = 8
    state_dim = 16
    action_dim = 4
    net_width = 32
    user_num = 4

    key = jax.random.PRNGKey(0)
    k_params, k_state, k_action = jax.random.split(key, 3)
    params = init_params(k_params, state_dim, action_dim, net_width, user_num)
    state = jax.random.normal(k_state, (batch, state_dim), jnp.float32)
    action = jax.random.normal(k_action, (batch, action_dim), jnp.float32)

    q1, q2 = q_critic_forward(state, action, params, user_num=user_num)
    q1 = jax.block_until_ready(q1)
    q2 = jax.block_until_ready(q2)

    r1, r2 = q_critic_reference(state, action, params)
    assert q1.shape == (batch, 1) and q2.shape == (batch, 1)
    assert jnp.allclose(q1, r1, atol=1e-4, rtol=1e-4), "q1 mismatch vs reference"
    assert jnp.allclose(q2, r2, atol=1e-4, rtol=1e-4), "q2 mismatch vs reference"

    print("KERNEL_OK")
</pallas_src>

<mosaic_0001>
module attributes {stable_mosaic.version = 11 : i64} {
  func.func @_q_critic_merged_kernel(%arg0: i32, %arg1: memref<8x24xf32, #tpu.memory_space<vmem>>, %arg2: memref<24x64xf32, #tpu.memory_space<vmem>>, %arg3: memref<1x64xf32, #tpu.memory_space<vmem>>, %arg4: memref<64x64xf32, #tpu.memory_space<vmem>>, %arg5: memref<1x64xf32, #tpu.memory_space<vmem>>, %arg6: memref<64x2xf32, #tpu.memory_space<vmem>>, %arg7: memref<1x2xf32, #tpu.memory_space<vmem>>, %arg8: memref<8x2xf32, #tpu.memory_space<vmem>>) attributes {dimension_semantics = [#tpu.dimension_semantics<parallel>], iteration_bounds = array<i64: 1>, scalar_prefetch = 0 : i64, scratch_operands = 0 : i64, tpu.core_type = #tpu.core_type<tc>, window_params = [{transform_indices = @transform_0, window_bounds = array<i64: 8, 24>}, {pipeline_mode = #tpu.pipeline_mode<synchronous>, transform_indices = @transform_1, window_bounds = array<i64: 24, 64>}, {pipeline_mode = #tpu.pipeline_mode<synchronous>, transform_indices = @transform_2, window_bounds = array<i64: 1, 64>}, {pipeline_mode = #tpu.pipeline_mode<synchronous>, transform_indices = @transform_3, window_bounds = array<i64: 64, 64>}, {pipeline_mode = #tpu.pipeline_mode<synchronous>, transform_indices = @transform_4, window_bounds = array<i64: 1, 64>}, {pipeline_mode = #tpu.pipeline_mode<synchronous>, transform_indices = @transform_5, window_bounds = array<i64: 64, 2>}, {pipeline_mode = #tpu.pipeline_mode<synchronous>, transform_indices = @transform_6, window_bounds = array<i64: 1, 2>}, {transform_indices = @transform_7, window_bounds = array<i64: 8, 2>}]} {
    %c0 = arith.constant 0 : index
    %c0_0 = arith.constant 0 : index
    %0 = vector.load %arg1[%c0, %c0_0] : memref<8x24xf32, #tpu.memory_space<vmem>>, vector<8x24xf32>
    %c0_1 = arith.constant 0 : index
    %c0_2 = arith.constant 0 : index
    %1 = vector.load %arg2[%c0_1, %c0_2] : memref<24x64xf32, #tpu.memory_space<vmem>>, vector<24x64xf32>
    %cst = arith.constant dense<0.000000e+00> : vector<8x64xf32>
    %2 = tpu.matmul %0, %1, %cst {dimension_numbers = #tpu.dot_dimension_numbers<[1], [0], [0], [1], [0, 0, 1, 1], [], []>} : vector<8x24xf32>, vector<24x64xf32>, vector<8x64xf32> -> vector<8x64xf32>
    %c0_3 = arith.constant 0 : index
    %c0_4 = arith.constant 0 : index
    %3 = vector.load %arg3[%c0_3, %c0_4] : memref<1x64xf32, #tpu.memory_space<vmem>>, vector<1x64xf32>
    %4 = vector.broadcast %3 : vector<1x64xf32> to vector<8x64xf32>
    %5 = arith.addf %2, %4 : vector<8x64xf32>
    %cst_5 = arith.constant 0.000000e+00 : f32
    %6 = vector.broadcast %cst_5 : f32 to vector<8x64xf32>
    %7 = arith.maximumf %5, %6 : vector<8x64xf32>
    %c0_6 = arith.constant 0 : index
    %c0_7 = arith.constant 0 : index
    %8 = vector.load %arg4[%c0_6, %c0_7] : memref<64x64xf32, #tpu.memory_space<vmem>>, vector<64x64xf32>
    %cst_8 = arith.constant dense<0.000000e+00> : vector<8x64xf32>
    %9 = tpu.matmul %7, %8, %cst_8 {dimension_numbers = #tpu.dot_dimension_numbers<[1], [0], [0], [1], [0, 0, 1, 1], [], []>} : vector<8x64xf32>, vector<64x64xf32>, vector<8x64xf32> -> vector<8x64xf32>
    %c0_9 = arith.constant 0 : index
    %c0_10 = arith.constant 0 : index
    %10 = vector.load %arg5[%c0_9, %c0_10] : memref<1x64xf32, #tpu.memory_space<vmem>>, vector<1x64xf32>
    %11 = vector.broadcast %10 : vector<1x64xf32> to vector<8x64xf32>
    %12 = arith.addf %9, %11 : vector<8x64xf32>
    %cst_11 = arith.constant 0.000000e+00 : f32
    %13 = vector.broadcast %cst_11 : f32 to vector<8x64xf32>
    %14 = arith.maximumf %12, %13 : vector<8x64xf32>
    %c0_12 = arith.constant 0 : index
    %c0_13 = arith.constant 0 : index
    %15 = vector.load %arg6[%c0_12, %c0_13] : memref<64x2xf32, #tpu.memory_space<vmem>>, vector<64x2xf32>
    %cst_14 = arith.constant dense<0.000000e+00> : vector<8x2xf32>
    %16 = tpu.matmul %14, %15, %cst_14 {dimension_numbers = #tpu.dot_dimension_numbers<[1], [0], [0], [1], [0, 0, 1, 1], [], []>} : vector<8x64xf32>, vector<64x2xf32>, vector<8x2xf32> -> vector<8x2xf32>
    %c0_15 = arith.constant 0 : index
    %c0_16 = arith.constant 0 : index
    %17 = vector.load %arg7[%c0_15, %c0_16] : memref<1x2xf32, #tpu.memory_space<vmem>>, vector<1x2xf32>
    %18 = vector.broadcast %17 : vector<1x2xf32> to vector<8x2xf32>
    %19 = arith.addf %16, %18 : vector<8x2xf32>
    %c0_17 = arith.constant 0 : index
    %c0_18 = arith.constant 0 : index
    %20 = vector.load %arg8[%c0_17, %c0_18] : memref<8x2xf32, #tpu.memory_space<vmem>>, vector<8x2xf32>
    tpu.vector_store %arg8[%c0_17, %c0_18], %19 {strides = array<i32>} : memref<8x2xf32, #tpu.memory_space<vmem>>, vector<8x2xf32>,
    return
  }
  func.func @transform_0(%arg0: i32) -> (i32, i32) {
    %c0_i32 = arith.constant 0 : i32
    %c0_i32_0 = arith.constant 0 : i32
    return %arg0, %c0_i32 : i32, i32
  }
  func.func @transform_1(%arg0: i32) -> (i32, i32) {
    %c0_i32 = arith.constant 0 : i32
    %c0_i32_0 = arith.constant 0 : i32
    %c0_i32_1 = arith.constant 0 : i32
    return %c0_i32, %c0_i32_0 : i32, i32
  }
  func.func @transform_2(%arg0: i32) -> (i32, i32) {
    %c0_i32 = arith.constant 0 : i32
    %c0_i32_0 = arith.constant 0 : i32
    %c0_i32_1 = arith.constant 0 : i32
    return %c0_i32, %c0_i32_0 : i32, i32
  }
  func.func @transform_3(%arg0: i32) -> (i32, i32) {
    %c0_i32 = arith.constant 0 : i32
    %c0_i32_0 = arith.constant 0 : i32
    %c0_i32_1 = arith.constant 0 : i32
    return %c0_i32, %c0_i32_0 : i32, i32
  }
  func.func @transform_4(%arg0: i32) -> (i32, i32) {
    %c0_i32 = arith.constant 0 : i32
    %c0_i32_0 = arith.constant 0 : i32
    %c0_i32_1 = arith.constant 0 : i32
    return %c0_i32, %c0_i32_0 : i32, i32
  }
  func.func @transform_5(%arg0: i32) -> (i32, i32) {
    %c0_i32 = arith.constant 0 : i32
    %c0_i32_0 = arith.constant 0 : i32
    %c0_i32_1 = arith.constant 0 : i32
    return %c0_i32, %c0_i32_0 : i32, i32
  }
  func.func @transform_6(%arg0: i32) -> (i32, i32) {
    %c0_i32 = arith.constant 0 : i32
    %c0_i32_0 = arith.constant 0 : i32
    %c0_i32_1 = arith.constant 0 : i32
    return %c0_i32, %c0_i32_0 : i32, i32
  }
  func.func @transform_7(%arg0: i32) -> (i32, i32) {
    %c0_i32 = arith.constant 0 : i32
    %c0_i32_0 = arith.constant 0 : i32
    return %arg0, %c0_i32 : i32, i32
  }
}

</mosaic_0001>

<bundles_post_ra>
// kernel: tpu_custom_call.1
= control target key start
LH: loop header
LB: loop body
LE: loop exit
PB: predicated region body
PF: predicated region fallthrough
CT: control target
= control target key end

     0   :  { %12 = vsyncpa [#allocation3], 0  ;;  %s341_s0 = inlined_call_operand.hbm [shape: f32[8,24], index: 0, kind: input, shape index: {}]   ;;  %s342_s1 = inlined_call_operand.hbm [shape: f32[24,64], index: 1, kind: input, shape index: {}]   ;;  %s343_s2 = inlined_call_operand.vmem [shape: f32[1,64], index: 2, kind: input, shape index: {}]   ;;  %s344_s3 = inlined_call_operand.vmem [shape: f32[64,64], index: 3, kind: input, shape index: {}]   ;;  %s345_s4 = inlined_call_operand.vmem [shape: f32[1,64], index: 4, kind: input, shape index: {}]   ;;  %s346_s5 = inlined_call_operand.vmem [shape: f32[64,2], index: 5, kind: input, shape index: {}]   ;;  %s347_s6 = inlined_call_operand.vmem [shape: f32[1,2], index: 6, kind: input, shape index: {}]   ;;  %s348_s7 = inlined_call_operand.vmem [shape: f32[8,2], index: 7, kind: output, shape index: {}]  }
   0x1   :  { %s19_s26 = sshll.u32 %s341_s0, 4  ;;  %s20_s26 = int_to_ptr.hbm [resolvable:$true] %s19_s26 }
   0x2   :  { %13 = vsyncpa [#allocation5], 0  ;;  %s231_s27 = smov [#allocation2]   ;;  %s29_s8 = sshll.u32 %s342_s1, 4  ;;  %s30_s8 = int_to_ptr.hbm [resolvable:$true] %s29_s8 }
   0x3   :  { %s21_s28 = sshll.u32 %s231_s27, 4  ;;  %s232_s9 = smov [#allocation4]   ;;  %s22_s28 = int_to_ptr.vmem [resolvable:$true] %s21_s28 }
   0x4   :  { %24 = dma.hbm_to_vmem [thread:$0]  %s20_s26, 128, %s22_s28, [#allocation3]  }
   0x5   :  { %s31_s10 = sshll.u32 %s232_s9, 4  ;;  %s233_s11 = smov 128   ;;  %s32_s10 = int_to_ptr.vmem [resolvable:$true] %s31_s10 }
   0x6   :  { %s234_s12 = smov 8  }
   0x7   :  { %37 = dma.hbm_to_vmem [thread:$0]  %s30_s8, 384, %s32_s10, [#allocation5], %s233_s11, %s233_s11, %s234_s12  }
   0x8   :  { %227 = dma.done.wait [#allocation3], 128  }
   0x9   :  { %228 = vsyncadd [#allocation3], 4294967168 }
   0xa   :  { %229 = dma.done.wait [#allocation5], 384  }
   0xb   :  { %230 = vsyncadd [#allocation5], 4294966912  ;;  %v59_v0 = vld [vmem:[#allocation4 + $0x10] sm:$0xff]  ;;  %v58_v1 = vld [vmem:[#allocation4 + $0x8] sm:$0xff]  ;;  %vm64_vm0 = vcmask 195584   ;;  %vm101_vm1 = vcmask 523264  }
   0xc   :  { %81 = vmatpush.msra.mxu0 %v59_v0  ;;  %v96_v2 = vld [vmem:[%s344_s3 + $0x38] sm:$0xff]  ;;  %v95_v3 = vld [vmem:[%s344_s3 + $0x30] sm:$0xff]  ;;  %v57_v4 = vld [vmem:[#allocation4] sm:$0xff]  ;;  %vm161_vm2 = vcmask 15360  }
   0xd   :  { %v56_v5 = vld [vmem:[#allocation2] sm:$0xff]  ;;  %113 = vmatpush.msra.mxu1 %v96_v2  ;;  %v94_v6 = vld [vmem:[%s344_s3 + $0x28] sm:$0xff]  ;;  %v92_v8 = vld [vmem:[%s344_s3 + $0x18] sm:$0xff] }
   0xe   :  { %82 = vmatpush.msra.mxu0 %v58_v1  ;;  %v93_v7 = vld [vmem:[%s344_s3 + $0x20] sm:$0xff]  ;;  %v91_v9 = vld [vmem:[%s344_s3 + $0x10] sm:$0xff]  ;;  %v90_v10 = vld [vmem:[%s344_s3 + $0x8] sm:$0xff] }
   0xf   :  { %114 = vmatpush.msra.mxu1 %v95_v3  ;;  %v89_v11 = vld [vmem:[%s344_s3] sm:$0xff]  ;;  %v133_v12 = vld [vmem:[%s346_s5 + $0x38] sm:$0xff]  ;;  %v132_v13 = vld [vmem:[%s346_s5 + $0x30] sm:$0xff] }
  0x10   :  { %83 = vmatpush.msra.mxu0 %v57_v4  ;;  %149 = vmatpush.msra.mxu2 %v133_v12  ;;  %v131_v14 = vld [vmem:[%s346_s5 + $0x28] sm:$0xff]  ;;  %v130_v15 = vld [vmem:[%s346_s5 + $0x20] sm:$0xff]  ;;  %v129_v16 = vld [vmem:[%s346_s5 + $0x18] sm:$0xff] }
  0x11   :  { %169 = vmatmul.msk.f32.vlgmr.msra.gmra.mxu0 %vm64_vm0, %v56_v5  ;;  %115 = vmatpush.msra.mxu1 %v94_v6  ;;  %v176_v17 = vld [vmem:[%s343_s2] ss:$0 sm:$0xff]  ;;  %v128_v21 = vld [vmem:[%s346_s5 + $0x10] sm:$0xff]  ;;  %v127_v22 = vld [vmem:[%s346_s5 + $0x8] sm:$0xff] }
  0x12   :  { %150 = vmatpush.msra.mxu2 %v132_v13  ;;  %v126_v23 = vld [vmem:[%s346_s5] sm:$0xff] }
  0x13   :  { %116 = vmatpush.msra.mxu1 %v93_v7  ;;  %v177_v24 = vld [vmem:[%s345_s4] ss:$0 sm:$0xff] }
  0x14   :  { %151 = vmatpush.msra.mxu2 %v131_v14  ;;  %v178_v28 = vld [vmem:[%s347_s6] ss:$0 sm:$0xff] }
  0x15   :  { %117 = vmatpush.msra.mxu1 %v92_v8 }
  0x16   :  { %152 = vmatpush.msra.mxu2 %v130_v15 }
  0x17   :  { %118 = vmatpush.msra.mxu1 %v91_v9 }
  0x18   :  { %153 = vmatpush.msra.mxu2 %v129_v16 }
  0x19   :  { %119 = vmatpush.msra.mxu1 %v90_v10 }
  0x1a   :  { %154 = vmatpush.msra.mxu2 %v128_v21 }
  0x1b   :  { %120 = vmatpush.msra.mxu1 %v89_v11 }
  0x1c   :  { %155 = vmatpush.msra.mxu2 %v127_v22 }
  0x1e   :  { %156 = vmatpush.msra.mxu2 %v126_v23 }
  0x8e   :  { %v85_v18 = vpop.f32.mrf.mxu0 }
  0x8f   :  { %v86_v19 = vadd.f32 %v176_v17, %v85_v18 }
  0x91   :  { %v88_v20 = vmax.f32 %v86_v19, 0.0 }
  0x93   :  { %170 = vmatmul.msk.f32.vlgmr.msra.gmra.mxu1 %vm101_vm1, %v88_v20 }
 0x110   :  { %v122_v25 = vpop.f32.mrf.mxu1 }
 0x111   :  { %v123_v26 = vadd.f32 %v177_v24, %v122_v25 }
 0x113   :  { %v125_v27 = vmax.f32 %v123_v26, 0.0 }
 0x115   :  { %171 = vmatmul.msk.f32.vlgmr.msra.gmra.mxu2 %vm101_vm1, %v125_v27 }
 0x198   :  { %v158_v29 = vpop.f32.mrf.mxu2 }
 0x199   :  { %v159_v30 = vadd.f32 %v178_v28, %v158_v29 }
 0x19b   :  { %162 = vst.msk [vmem:[%s348_s7] sm:$0xff] %vm161_vm2, %v159_v30 }
 0x19c   :  { %167 = vsyncpa [#allocation3], 1 }
 0x19d   :  { %168 = vsyncpa [#allocation5], 1 }

</bundles_post_ra>
